<compile_context>
chip_gen: v5e
topology: v5e:2x2
jax: 0.10.0
libtpu: 0.0.40
codegen_flags: <defaults>
</compile_context>

<pallas_src>
import jax
import jax.numpy as jnp
from jax.experimental import pallas as pl
from jax.experimental.pallas import tpu as pltpu


def edge_layer_kernel(dst_ref, e_ref, w_ref, b_ref, o_ref, acc_ref):
    # Grid = (node tiles, edge tiles); the edge axis is the reduction.
    j = pl.program_id(1)

    @pl.when(j == 0)
    def _init():
        acc_ref[...] = jnp.zeros_like(acc_ref)

    tn = o_ref.shape[0]   # node tile size
    te = e_ref.shape[0]   # edge tile size

    # One-hot incidence tile generated on the fly (never touches HBM):
    #   a[n, e] = 1.0 iff dst(e) == node_base + n
    node_ids = pl.program_id(0) * tn + jax.lax.broadcasted_iota(
        jnp.int32, (tn, te), 0
    )
    a_tile = (dst_ref[...] == node_ids).astype(e_ref.dtype)      # (tn, te)

    # Partial segment-sum for this edge tile (MXU), f32 accumulation.
    acc_ref[...] += jnp.dot(a_tile, e_ref[...], preferred_element_type=jnp.float32)

    @pl.when(j == pl.num_programs(1) - 1)
    def _finalize():
        # Linear layer + bias, applied exactly once per node tile.
        out = jnp.dot(acc_ref[...], w_ref[...], preferred_element_type=jnp.float32)
        o_ref[...] = (out + b_ref[...]).astype(o_ref.dtype)


def _round_up(x, m):
    return ((x + m - 1) // m) * m


def edge_layer_forward(edge_feats, dst_idx, num_nodes, weight, bias,
                       *, node_tile=256, edge_tile=1024):
    """edge_feats: (E, F_in) f32, dst_idx: (E,) int32, weight: (F_out, F_in), bias: (F_out,)."""
    E, F_in = edge_feats.shape
    F_out = weight.shape[0]

    # ---- Tile sizes / padded problem sizes -------------------------------
    tn = min(node_tile, _round_up(num_nodes, 8))
    te = min(edge_tile, _round_up(E, 128))
    n_pad = _round_up(num_nodes, tn)
    e_pad = _round_up(E, te)
    f_out_pad = _round_up(max(F_out, 128), 128)      # lane-dense output / W / b

    # ---- Pad streamed operands (padding contributes nothing) -------------
    ef = edge_feats
    dst = dst_idx.astype(jnp.int32)
    if e_pad != E:
        ef = jnp.pad(ef, ((0, e_pad - E), (0, 0)))
        dst = jnp.pad(dst, (0, e_pad - E), constant_values=-1)   # matches no node
    dst2 = dst.reshape(1, e_pad)

    w_t = jnp.pad(weight.T.astype(jnp.float32), ((0, 0), (0, f_out_pad - F_out)))
    b2 = jnp.pad(bias.astype(jnp.float32), (0, f_out_pad - F_out)).reshape(1, f_out_pad)

    grid = (n_pad // tn, e_pad // te)

    # TODO(synk): if F_out < F_in, project edge features per edge tile first
    # (edge @ W inside the reduction loop) and aggregate projected features.

    cost = pl.CostEstimate(
        flops=2 * n_pad * e_pad * F_in + 2 * n_pad * F_in * f_out_pad,
        transcendentals=0,
        bytes_accessed=(e_pad * F_in * ef.dtype.itemsize + e_pad * 4
                        + F_in * f_out_pad * 4 + f_out_pad * 4
                        + n_pad * f_out_pad * 4),
    )

    out = pl.pallas_call(
        edge_layer_kernel,
        out_shape=jax.ShapeDtypeStruct((n_pad, f_out_pad), jnp.float32),
        grid_spec=pltpu.PrefetchScalarGridSpec(
            num_scalar_prefetch=0,
            grid=grid,
            in_specs=[
                pl.BlockSpec((1, te), lambda i, j: (0, j)),             # dst indices
                pl.BlockSpec((te, F_in), lambda i, j: (j, 0)),          # edge features
                pl.BlockSpec((F_in, f_out_pad), lambda i, j: (0, 0)),   # W^T (padded)
                pl.BlockSpec((1, f_out_pad), lambda i, j: (0, 0)),      # bias (padded)
            ],
            out_specs=pl.BlockSpec((tn, f_out_pad), lambda i, j: (i, 0)),
            scratch_shapes=[pltpu.VMEM((tn, F_in), jnp.float32)],       # h accumulator
        ),
        compiler_params=pltpu.CompilerParams(
            dimension_semantics=("parallel", "arbitrary"),
            vmem_limit_bytes=48 * 1024 * 1024,
        ),
        cost_estimate=cost,
    )(dst2, ef, w_t, b2)

    return out[:num_nodes, :F_out]


if __name__ == "__main__":
    key = jax.random.PRNGKey(0)
    k_ef, k_dst, k_w, k_b = jax.random.split(key, 4)

    num_nodes = 8
    num_edges = 16
    in_feats = 8
    out_feats = 16

    edge_feats = jax.random.normal(k_ef, (num_edges, in_feats), dtype=jnp.float32)
    dst_idx = jax.random.randint(k_dst, (num_edges,), 0, num_nodes, dtype=jnp.int32)

    # Deterministic Linear params (synthetic init, same shapes as nn.Linear).
    bound = 1.0 / jnp.sqrt(in_feats)
    weight = jax.random.uniform(
        k_w, (out_feats, in_feats), minval=-bound, maxval=bound, dtype=jnp.float32
    )
    bias = jax.random.uniform(
        k_b, (out_feats,), minval=-bound, maxval=bound, dtype=jnp.float32
    )

    out = edge_layer_forward(edge_feats, dst_idx, num_nodes, weight, bias)
    out = jax.block_until_ready(out)

    # Reference check (pure JAX): segment-sum then linear.
    h_ref = jax.ops.segment_sum(edge_feats, dst_idx, num_segments=num_nodes)
    ref = h_ref @ weight.T + bias
    assert out.shape == (num_nodes, out_feats)
    assert jnp.allclose(out, ref, atol=1e-5, rtol=1e-5)

    print("KERNEL_OK")
</pallas_src>

<mosaic_0001>
module attributes {stable_mosaic.version = 11 : i64} {
  func.func @edge_layer_kernel(%arg0: i32, %arg1: i32, %arg2: memref<1x128xi32, #tpu.memory_space<vmem>>, %arg3: memref<128x8xf32, #tpu.memory_space<vmem>>, %arg4: memref<8x128xf32, #tpu.memory_space<vmem>>, %arg5: memref<1x128xf32, #tpu.memory_space<vmem>>, %arg6: memref<8x128xf32, #tpu.memory_space<vmem>>, %arg7: memref<8x8xf32, #tpu.memory_space<vmem>>) attributes {dimension_semantics = [#tpu.dimension_semantics<parallel>, #tpu.dimension_semantics<arbitrary>], iteration_bounds = array<i64: 1, 1>, scalar_prefetch = 0 : i64, scratch_operands = 1 : i64, tpu.core_type = #tpu.core_type<tc>, window_params = [{transform_indices = @transform_0, window_bounds = array<i64: 1, 128>}, {transform_indices = @transform_1, window_bounds = array<i64: 128, 8>}, {pipeline_mode = #tpu.pipeline_mode<synchronous>, transform_indices = @transform_2, window_bounds = array<i64: 8, 128>}, {pipeline_mode = #tpu.pipeline_mode<synchronous>, transform_indices = @transform_3, window_bounds = array<i64: 1, 128>}, {transform_indices = @transform_4, window_bounds = array<i64: 8, 128>}]} {
    %c0_i32 = arith.constant 0 : i32
    %0 = arith.cmpi eq, %arg1, %c0_i32 : i32
    %1 = arith.extui %0 : i1 to i32
    %c0_i32_0 = arith.constant 0 : i32
    %2 = arith.cmpi ne, %1, %c0_i32_0 : i32
    scf.if %2 {
      %cst_10 = arith.constant 0.000000e+00 : f32
      %20 = vector.broadcast %cst_10 : f32 to vector<8x8xf32>
      %c0_11 = arith.constant 0 : index
      %c0_12 = arith.constant 0 : index
      %21 = vector.load %arg7[%c0_11, %c0_12] : memref<8x8xf32, #tpu.memory_space<vmem>>, vector<8x8xf32>
      tpu.vector_store %arg7[%c0_11, %c0_12], %20 {strides = array<i32>} : memref<8x8xf32, #tpu.memory_space<vmem>>, vector<8x8xf32>,
    } else {
    }
    %c8_i32 = arith.constant 8 : i32
    %3 = arith.muli %arg0, %c8_i32 : i32
    %4 = tpu.iota {dimensions = array<i32: 0>} : vector<8x128xi32>
    %5 = vector.broadcast %3 : i32 to vector<8x128xi32>
    %6 = arith.addi %5, %4 : vector<8x128xi32>
    %c0 = arith.constant 0 : index
    %c0_1 = arith.constant 0 : index
    %7 = vector.load %arg2[%c0, %c0_1] : memref<1x128xi32, #tpu.memory_space<vmem>>, vector<1x128xi32>
    %8 = vector.broadcast %7 : vector<1x128xi32> to vector<8x128xi32>
    %9 = arith.cmpi eq, %8, %6 : vector<8x128xi32>
    %10 = arith.extui %9 : vector<8x128xi1> to vector<8x128xi32>
    %11 = arith.sitofp %10 : vector<8x128xi32> to vector<8x128xf32>
    %c0_2 = arith.constant 0 : index
    %c0_3 = arith.constant 0 : index
    %12 = vector.load %arg7[%c0_2, %c0_3] : memref<8x8xf32, #tpu.memory_space<vmem>>, vector<8x8xf32>
    %c0_4 = arith.constant 0 : index
    %c0_5 = arith.constant 0 : index
    %13 = vector.load %arg3[%c0_4, %c0_5] : memref<128x8xf32, #tpu.memory_space<vmem>>, vector<128x8xf32>
    %cst = arith.constant dense<0.000000e+00> : vector<8x8xf32>
    %14 = tpu.matmul %11, %13, %cst {dimension_numbers = #tpu.dot_dimension_numbers<[1], [0], [0], [1], [0, 0, 1, 1], [], []>} : vector<8x128xf32>, vector<128x8xf32>, vector<8x8xf32> -> vector<8x8xf32>
    %15 = arith.addf %12, %14 : vector<8x8xf32>
    %c0_6 = arith.constant 0 : index
    %c0_7 = arith.constant 0 : index
    %16 = vector.load %arg7[%c0_6, %c0_7] : memref<8x8xf32, #tpu.memory_space<vmem>>, vector<8x8xf32>
    tpu.vector_store %arg7[%c0_6, %c0_7], %15 {strides = array<i32>} : memref<8x8xf32, #tpu.memory_space<vmem>>, vector<8x8xf32>,
    %c0_i32_8 = arith.constant 0 : i32
    %17 = arith.cmpi eq, %arg1, %c0_i32_8 : i32
    %18 = arith.extui %17 : i1 to i32
    %c0_i32_9 = arith.constant 0 : i32
    %19 = arith.cmpi ne, %18, %c0_i32_9 : i32
    scf.if %19 {
      %c0_10 = arith.constant 0 : index
      %c0_11 = arith.constant 0 : index
      %20 = vector.load %arg7[%c0_10, %c0_11] : memref<8x8xf32, #tpu.memory_space<vmem>>, vector<8x8xf32>
      %c0_12 = arith.constant 0 : index
      %c0_13 = arith.constant 0 : index
      %21 = vector.load %arg4[%c0_12, %c0_13] : memref<8x128xf32, #tpu.memory_space<vmem>>, vector<8x128xf32>
      %cst_14 = arith.constant dense<0.000000e+00> : vector<8x128xf32>
      %22 = tpu.matmul %20, %21, %cst_14 {dimension_numbers = #tpu.dot_dimension_numbers<[1], [0], [0], [1], [0, 0, 1, 1], [], []>} : vector<8x8xf32>, vector<8x128xf32>, vector<8x128xf32> -> vector<8x128xf32>
      %c0_15 = arith.constant 0 : index
      %c0_16 = arith.constant 0 : index
      %23 = vector.load %arg5[%c0_15, %c0_16] : memref<1x128xf32, #tpu.memory_space<vmem>>, vector<1x128xf32>
      %24 = vector.broadcast %23 : vector<1x128xf32> to vector<8x128xf32>
      %25 = arith.addf %22, %24 : vector<8x128xf32>
      %c0_17 = arith.constant 0 : index
      %c0_18 = arith.constant 0 : index
      %26 = vector.load %arg6[%c0_17, %c0_18] : memref<8x128xf32, #tpu.memory_space<vmem>>, vector<8x128xf32>
      tpu.vector_store %arg6[%c0_17, %c0_18], %25 {strides = array<i32>} : memref<8x128xf32, #tpu.memory_space<vmem>>, vector<8x128xf32>,
    } else {
    }
    return
  }
  func.func @transform_0(%arg0: i32, %arg1: i32) -> (i32, i32) {
    %c0_i32 = arith.constant 0 : i32
    %c0_i32_0 = arith.constant 0 : i32
    return %c0_i32, %arg1 : i32, i32
  }
  func.func @transform_1(%arg0: i32, %arg1: i32) -> (i32, i32) {
    %c0_i32 = arith.constant 0 : i32
    %c0_i32_0 = arith.constant 0 : i32
    return %arg1, %c0_i32 : i32, i32
  }
  func.func @transform_2(%arg0: i32, %arg1: i32) -> (i32, i32) {
    %c0_i32 = arith.constant 0 : i32
    %c0_i32_0 = arith.constant 0 : i32
    %c0_i32_1 = arith.constant 0 : i32
    return %c0_i32, %c0_i32_0 : i32, i32
  }
  func.func @transform_3(%arg0: i32, %arg1: i32) -> (i32, i32) {
    %c0_i32 = arith.constant 0 : i32
    %c0_i32_0 = arith.constant 0 : i32
    %c0_i32_1 = arith.constant 0 : i32
    return %c0_i32, %c0_i32_0 : i32, i32
  }
  func.func @transform_4(%arg0: i32, %arg1: i32) -> (i32, i32) {
    %c0_i32 = arith.constant 0 : i32
    %c0_i32_0 = arith.constant 0 : i32
    return %arg0, %c0_i32 : i32, i32
  }
}

</mosaic_0001>

<bundles_post_ra>
// kernel: tpu_custom_call.1
= control target key start
LH: loop header
LB: loop body
LE: loop exit
PB: predicated region body
PF: predicated region fallthrough
CT: control target
= control target key end

     0   :  { %vm22_vm0 = vcmask 64512   ;;  %v157_v2 = vmov 0.0   ;;  %s248_s0 = inlined_call_operand.vmem [shape: s32[1,128], index: 0, kind: input, shape index: {}]   ;;  %s249_s1 = inlined_call_operand.vmem [shape: f32[128,8], index: 1, kind: input, shape index: {}]   ;;  %s250_s2 = inlined_call_operand.vmem [shape: f32[8,128], index: 2, kind: input, shape index: {}]   ;;  %s251_s3 = inlined_call_operand.vmem [shape: f32[1,128], index: 3, kind: input, shape index: {}]   ;;  %s252_s4 = inlined_call_operand.hbm [shape: f32[8,128], index: 4, kind: output, shape index: {}]  }
   0x1   :  { %v50_v0 = vld [vmem:[%s249_s1 + $0x78] sm:$0xff]  ;;  %v49_v1 = vld [vmem:[%s249_s1 + $0x70] sm:$0xff]  ;;  %23 = vst.msk [vmem:[#allocation2] sm:$0xff] %vm22_vm0, %v157_v2  ;;  %v48_v3 = vld [vmem:[%s249_s1 + $0x68] sm:$0xff] }
   0x2   :  { %51 = vmatpush.msra.mxu0 %v50_v0  ;;  %v47_v4 = vld [vmem:[%s249_s1 + $0x60] sm:$0xff]  ;;  %v46_v5 = vld [vmem:[%s249_s1 + $0x58] sm:$0xff] }
   0x4   :  { %52 = vmatpush.msra.mxu0 %v49_v1 }
   0x6   :  { %53 = vmatpush.msra.mxu0 %v48_v3 }
   0x7   :  { %9 = vsyncpa [#allocation4], 0  ;;  %v45_v6 = vld [vmem:[%s249_s1 + $0x50] sm:$0xff]  ;;  %v44_v7 = vld [vmem:[%s249_s1 + $0x48] sm:$0xff]  ;;  %v25_v13 = vlaneseq  ;;  %v158_v20 = vmov 1.0   ;;  %s159_s25 = smov [#allocation3]  }
   0x8   :  { %54 = vmatpush.msra.mxu0 %v47_v4  ;;  %v43_v8 = vld [vmem:[%s249_s1 + $0x40] sm:$0xff]  ;;  %v42_v9 = vld [vmem:[%s249_s1 + $0x38] sm:$0xff]  ;;  %v41_v10 = vld [vmem:[%s249_s1 + $0x30] sm:$0xff]  ;;  %s112_s26 = sshll.u32 %s159_s25, 4  ;;  %s114_s29 = sshll.u32 %s252_s4, 4  ;;  %s113_s26 = int_to_ptr.vmem [resolvable:$true] %s112_s26  ;;  %s115_s29 = int_to_ptr.hbm [resolvable:$true] %s114_s29 }
   0x9   :  { %v40_v11 = vld [vmem:[%s249_s1 + $0x28] sm:$0xff]  ;;  %v39_v12 = vld [vmem:[%s249_s1 + $0x20] sm:$0xff]  ;;  %v38_v14 = vld [vmem:[%s249_s1 + $0x18] sm:$0xff]  ;;  %v26_v16 = vshrl.u32 %v25_v13, 7 }
   0xa   :  { %55 = vmatpush.msra.mxu0 %v46_v5  ;;  %v37_v15 = vld [vmem:[%s249_s1 + $0x10] sm:$0xff]  ;;  %v129_v17 = vld [vmem:[%s248_s0] ss:$0 sm:$0xff]  ;;  %v36_v18 = vld [vmem:[%s249_s1 + $0x8] sm:$0xff] }
   0xb   :  { %v35_v19 = vld [vmem:[%s249_s1] sm:$0xff]  ;;  %vm31_vm1 = vcmp.eq.s32.totalorder %v129_v17, %v26_v16 }
   0xc   :  { %56 = vmatpush.msra.mxu0 %v45_v6  ;;  %v78_v21 = vld [vmem:[%s250_s2] sm:$0xff] }
   0xd   :  { %101 = vmatpush.msra.mxu1 %v78_v21  ;;  %v34_v22 = vld [vmem:[#allocation2] sm:$0xff] }
   0xe   :  { %57 = vmatpush.msra.mxu0 %v44_v7  ;;  %v130_v26 = vld [vmem:[%s251_s3] ss:$0 sm:$0xff] }
  0x10   :  { %58 = vmatpush.msra.mxu0 %v43_v8 }
  0x12   :  { %59 = vmatpush.msra.mxu0 %v42_v9 }
  0x14   :  { %60 = vmatpush.msra.mxu0 %v41_v10 }
  0x16   :  { %61 = vmatpush.msra.mxu0 %v40_v11 }
  0x18   :  { %62 = vmatpush.msra.mxu0 %v39_v12 }
  0x1a   :  { %63 = vmatpush.msra.mxu0 %v38_v14 }
  0x1c   :  { %64 = vmatpush.msra.mxu0 %v37_v15 }
  0x1e   :  { %65 = vmatpush.msra.mxu0 %v36_v18 }
  0x20   :  { %66 = vmatpush.msra.mxu0 %v35_v19 }
  0x21   :  { %124 = vmatmul.msk.f32.vlgmr.msra.gmra.mxu0 %vm31_vm1, %v158_v20 }
  0x9e   :  { %v68_v23 = vpop.f32.mrf.mxu0 }
  0x9f   :  { %v71_v24 = vadd.f32 %v68_v23, %v34_v22 }
  0xa1   :  { %73 = vst.msk [vmem:[#allocation2] sm:$0xff] %vm22_vm0, %v71_v24 }
  0xa8   :  { %v77_v25 = vld [vmem:[#allocation2] sm:$0xff] }
  0xa9   :  { %125 = vmatmul.msk.f32.vlgmr.msra.gmra.mxu1 %vm22_vm0, %v77_v25 }
 0x126   :  { %v103_v27 = vpop.f32.mrf.mxu1 }
 0x127   :  { %v104_v28 = vadd.f32 %v130_v26, %v103_v27 }
 0x129   :  { %106 = vst [vmem:[#allocation3] sm:$0xff] %v104_v28 }
 0x12a   :  { %117 = dma.vmem_to_hbm [thread:$0]  %s113_s26, 128, %s115_s29, [#allocation4]  }
 0x12b   :  { %155 = dma.done.wait [#allocation4], 128  }
 0x12c   :  { %156 = vsyncadd [#allocation4], 4294967168 }
 0x12d   :  { %122 = vsyncpa [#allocation4], 1 }

</bundles_post_ra>
